<compile_context>
chip_gen: v7x
topology: tpu7x:2x2x1
jax: 0.10.0
libtpu: 0.0.40
codegen_flags: <defaults>
</compile_context>

<pallas_src>
import math

import jax
import jax.numpy as jnp
from jax.experimental import pallas as pl
from jax.experimental.pallas import tpu as pltpu

# ----------------------------- config ---------------------------------------
B = 2          # batch
S = 8          # sequence length
H = 32         # hidden size
N_HEADS = 4
D_HEAD = H // N_HEADS
VOCAB = 50
VOCAB_PAD = 64          # padded vocab rows resident in VMEM (zeros never selected)
MAX_POS = 16
TYPE_VOCAB = 2
LN_EPS = 1e-12


# ----------------------------- kernel ---------------------------------------
def _embed_attn_kernel(ids_ref, we_ref, pe_ref, mask_ref,
                       wqkv_ref, wo_ref, bqkv_ref, vec_ref, out_ref):
    # packed per-hidden vectors: [ln1_g, ln1_b, type_emb0, bo, ln2_g, ln2_b]
    vecs = vec_ref[...]                                   # (6, H) f32
    ln1_g, ln1_b = vecs[0:1], vecs[1:2]
    te = vecs[2:3]
    bo = vecs[3:4]
    ln2_g, ln2_b = vecs[4:5], vecs[5:6]

    # ---- fused word-embedding gather: one-hot @ table on the MXU -----------
    ids = ids_ref[0]                                      # (S, 1) int32
    col = jax.lax.broadcasted_iota(jnp.int32, (S, VOCAB_PAD), 1)
    onehot = (col == ids).astype(jnp.float32)             # (S, VOCAB_PAD)
    x = jnp.dot(onehot, we_ref[...],
                preferred_element_type=jnp.float32)       # (S, H)
    x = x + pe_ref[...] + te                              # + pos + type-0 emb

    # ---- LayerNorm 1 --------------------------------------------------------
    mu = jnp.mean(x, axis=-1, keepdims=True)
    var = jnp.mean((x - mu) * (x - mu), axis=-1, keepdims=True)
    h = (x - mu) * jax.lax.rsqrt(var + LN_EPS)
    h = h * ln1_g + ln1_b                                 # (S, H) f32

    # ---- QKV projections, heads-as-batch (bf16 MXU, f32 accumulate) --------
    h_b = jnp.broadcast_to(h.astype(jnp.bfloat16)[None], (N_HEADS, S, H))
    w_all = wqkv_ref[...]                                 # (3N, H, D) bf16
    b_all = bqkv_ref[...]                                 # (3N, 1, D) f32
    wq_h, wk_h, wv_h = (w_all[0:N_HEADS],
                        w_all[N_HEADS:2 * N_HEADS],
                        w_all[2 * N_HEADS:3 * N_HEADS])
    bq_h, bk_h, bv_h = (b_all[0:N_HEADS],
                        b_all[N_HEADS:2 * N_HEADS],
                        b_all[2 * N_HEADS:3 * N_HEADS])

    qh = jnp.einsum('nsh,nhd->nsd', h_b, wq_h,
                    preferred_element_type=jnp.float32) + bq_h   # (N, S, D)
    kh = jnp.einsum('nsh,nhd->nsd', h_b, wk_h,
                    preferred_element_type=jnp.float32) + bk_h
    vh = jnp.einsum('nsh,nhd->nsd', h_b, wv_h,
                    preferred_element_type=jnp.float32) + bv_h

    # ---- scaled dot-product attention, all heads in one batched pass -------
    scale = 1.0 / math.sqrt(D_HEAD)
    scores = jnp.einsum('nqd,nkd->nqk',
                        qh.astype(jnp.bfloat16), kh.astype(jnp.bfloat16),
                        preferred_element_type=jnp.float32) * scale
    scores = scores + mask_ref[0]                         # (1,S) -> (N,S,S)
    m = jnp.max(scores, axis=-1, keepdims=True)
    e = jnp.exp(scores - m)
    p = e * pl.reciprocal(jnp.sum(e, axis=-1, keepdims=True), approx=True)
    ctx = jnp.einsum('nqk,nkd->nqd',
                     p.astype(jnp.bfloat16), vh.astype(jnp.bfloat16),
                     preferred_element_type=jnp.float32)  # (N, S, D)

    # ---- output projection (per-head partials summed) + residual + LN2 -----
    attn_nh = jnp.einsum('nsd,ndh->nsh',
                         ctx.astype(jnp.bfloat16), wo_ref[...],
                         preferred_element_type=jnp.float32)     # (N, S, H)
    attn = jnp.sum(attn_nh, axis=0) + bo                  # (S, H)

    y = attn + h
    mu2 = jnp.mean(y, axis=-1, keepdims=True)
    var2 = jnp.mean((y - mu2) * (y - mu2), axis=-1, keepdims=True)
    out = (y - mu2) * jax.lax.rsqrt(var2 + LN_EPS)
    out_ref[0] = out * ln2_g + ln2_b


# ----------------------------- wrapper ---------------------------------------
def embedding_and_attention(input_ids, mask_add, params):
    """input_ids: (B, S) int32; mask_add: (B, 1, S) additive f32 mask."""
    # One-time, trace-time repacking of tiny parameter tensors (no activation-
    # sized work left in the wrapper).
    we_pad = jnp.pad(params["word_emb"],
                     ((0, VOCAB_PAD - VOCAB), (0, 0)))            # (64, H) f32
    pe_s = params["pos_emb"][:S]                                  # (S, H) f32

    def to_heads_in(w):   # (H_in, H_out) -> (N, H_in, D)  [head-major out dim]
        return w.reshape(H, N_HEADS, D_HEAD).transpose(1, 0, 2)

    wqkv = jnp.concatenate([to_heads_in(params["wq"]),
                            to_heads_in(params["wk"]),
                            to_heads_in(params["wv"])],
                           axis=0).astype(jnp.bfloat16)           # (3N, H, D)
    wo_h = params["wo"].reshape(N_HEADS, D_HEAD, H).astype(jnp.bfloat16)  # (N,D,H)
    bqkv = jnp.concatenate([params["bq"].reshape(N_HEADS, 1, D_HEAD),
                            params["bk"].reshape(N_HEADS, 1, D_HEAD),
                            params["bv"].reshape(N_HEADS, 1, D_HEAD)],
                           axis=0)                                # (3N, 1, D) f32
    vecs = jnp.concatenate([params["ln1_g"], params["ln1_b"],
                            params["type_emb"][0:1],
                            params["bo"], params["ln2_g"], params["ln2_b"]],
                           axis=0)                                # (6, H) f32
    ids3 = input_ids.reshape(B, S, 1).astype(jnp.int32)

    row3 = lambda b: (b, 0, 0)          # per-batch block
    c2 = lambda b: (0, 0)               # whole tensor every step (resident)
    c3 = lambda b: (0, 0, 0)

    out = pl.pallas_call(
        _embed_attn_kernel,
        out_shape=jax.ShapeDtypeStruct((B, S, H), jnp.float32),
        grid=(B,),
        in_specs=[
            pl.BlockSpec((1, S, 1), row3),                  # token ids
            pl.BlockSpec((VOCAB_PAD, H), c2),               # word-emb table
            pl.BlockSpec((S, H), c2),                       # pos-emb rows
            pl.BlockSpec((1, 1, S), row3),                  # additive mask
            pl.BlockSpec((3 * N_HEADS, H, D_HEAD), c3),     # Wq|Wk|Wv (bf16)
            pl.BlockSpec((N_HEADS, D_HEAD, H), c3),         # Wo (bf16)
            pl.BlockSpec((3 * N_HEADS, 1, D_HEAD), c3),     # bq|bk|bv
            pl.BlockSpec((6, H), c2),                       # ln1, type0, bo, ln2
        ],
        out_specs=pl.BlockSpec((1, S, H), row3),
        compiler_params=pltpu.CompilerParams(
            dimension_semantics=("parallel",)),             # v7x: one batch / TC
    )(ids3, we_pad, pe_s, mask_add, wqkv, wo_h, bqkv, vecs)
    return out


# ----------------------------- reference (pure JAX) ---------------------------
def reference(input_ids, mask_add, params):
    x = (params["word_emb"][input_ids]
         + params["pos_emb"][jnp.arange(S)][None, :, :]
         + params["type_emb"][0][None, None, :])
    mu = x.mean(-1, keepdims=True)
    var = ((x - mu) ** 2).mean(-1, keepdims=True)
    h = (x - mu) / jnp.sqrt(var + LN_EPS) * params["ln1_g"][0] + params["ln1_b"][0]
    q = h @ params["wq"] + params["bq"][0]
    k = h @ params["wk"] + params["bk"][0]
    v = h @ params["wv"] + params["bv"][0]
    qh = q.reshape(B, S, N_HEADS, D_HEAD).transpose(0, 2, 1, 3)
    kh = k.reshape(B, S, N_HEADS, D_HEAD).transpose(0, 2, 1, 3)
    vh = v.reshape(B, S, N_HEADS, D_HEAD).transpose(0, 2, 1, 3)
    scores = jnp.einsum("bhqd,bhkd->bhqk", qh, kh) / math.sqrt(D_HEAD)
    scores = scores + mask_add[:, None, :, :]
    p = jax.nn.softmax(scores, axis=-1)
    ctx = jnp.einsum("bhqk,bhkd->bhqd", p, vh).transpose(0, 2, 1, 3).reshape(B, S, H)
    attn = ctx @ params["wo"] + params["bo"][0]
    y = attn + h
    mu2 = y.mean(-1, keepdims=True)
    var2 = ((y - mu2) ** 2).mean(-1, keepdims=True)
    return (y - mu2) / jnp.sqrt(var2 + LN_EPS) * params["ln2_g"][0] + params["ln2_b"][0]


# ----------------------------- main -------------------------------------------
if __name__ == "__main__":
    key = jax.random.PRNGKey(0)
    ks = jax.random.split(key, 12)
    scale = 0.05
    params = {
        "word_emb": jax.random.normal(ks[0], (VOCAB, H), jnp.float32) * scale,
        "pos_emb":  jax.random.normal(ks[1], (MAX_POS, H), jnp.float32) * scale,
        "type_emb": jax.random.normal(ks[2], (TYPE_VOCAB, H), jnp.float32) * scale,
        "ln1_g": jnp.ones((1, H), jnp.float32),
        "ln1_b": jnp.zeros((1, H), jnp.float32),
        # synthetic weights stored as (in, out) and applied as x @ W
        "wq": jax.random.normal(ks[3], (H, H), jnp.float32) * scale,
        "bq": jax.random.normal(ks[4], (1, H), jnp.float32) * scale,
        "wk": jax.random.normal(ks[5], (H, H), jnp.float32) * scale,
        "bk": jax.random.normal(ks[6], (1, H), jnp.float32) * scale,
        "wv": jax.random.normal(ks[7], (H, H), jnp.float32) * scale,
        "bv": jax.random.normal(ks[8], (1, H), jnp.float32) * scale,
        "wo": jax.random.normal(ks[9], (H, H), jnp.float32) * scale,
        "bo": jax.random.normal(ks[10], (1, H), jnp.float32) * scale,
        "ln2_g": jnp.ones((1, H), jnp.float32),
        "ln2_b": jnp.zeros((1, H), jnp.float32),
    }

    input_ids = jax.random.randint(ks[11], (B, S), 0, VOCAB, dtype=jnp.int32)
    # valid lengths [8, 5] -> additive mask (0 keep, -10000 masked), shape (B,1,S)
    lengths = jnp.array([8, 5], dtype=jnp.int32)
    keep = (jnp.arange(S)[None, :] < lengths[:, None]).astype(jnp.float32)
    mask_add = ((1.0 - keep) * -10000.0)[:, None, :]

    out = embedding_and_attention(input_ids, mask_add, params)
    out = jax.block_until_ready(out)

    ref = reference(input_ids, mask_add, params)
    assert out.shape == (B, S, H)
    # bf16 MXU operands + approx reciprocal -> tolerance loosened vs pure-f32.
    assert jnp.allclose(out, ref, atol=2e-2, rtol=2e-2), "mismatch vs JAX reference"
    print("KERNEL_OK")
</pallas_src>

<mosaic_0001>
module attributes {stable_mosaic.version = 11 : i64} {
  func.func @_embed_attn_kernel(%arg0: i32, %arg1: memref<1x8x1xi32, #tpu.memory_space<vmem>>, %arg2: memref<64x32xf32, #tpu.memory_space<vmem>>, %arg3: memref<8x32xf32, #tpu.memory_space<vmem>>, %arg4: memref<1x1x8xf32, #tpu.memory_space<vmem>>, %arg5: memref<12x32x8xbf16, #tpu.memory_space<vmem>>, %arg6: memref<4x8x32xbf16, #tpu.memory_space<vmem>>, %arg7: memref<12x1x8xf32, #tpu.memory_space<vmem>>, %arg8: memref<6x32xf32, #tpu.memory_space<vmem>>, %arg9: memref<1x8x32xf32, #tpu.memory_space<vmem>>) attributes {dimension_semantics = [#tpu.dimension_semantics<parallel>], iteration_bounds = array<i64: 2>, scalar_prefetch = 0 : i64, scratch_operands = 0 : i64, tpu.core_type = #tpu.core_type<tc>, window_params = [{transform_indices = @transform_0, window_bounds = array<i64: 1, 8, 1>}, {pipeline_mode = #tpu.pipeline_mode<synchronous>, transform_indices = @transform_1, window_bounds = array<i64: 64, 32>}, {pipeline_mode = #tpu.pipeline_mode<synchronous>, transform_indices = @transform_2, window_bounds = array<i64: 8, 32>}, {transform_indices = @transform_3, window_bounds = array<i64: 1, 1, 8>}, {pipeline_mode = #tpu.pipeline_mode<synchronous>, transform_indices = @transform_4, window_bounds = array<i64: 12, 32, 8>}, {pipeline_mode = #tpu.pipeline_mode<synchronous>, transform_indices = @transform_5, window_bounds = array<i64: 4, 8, 32>}, {pipeline_mode = #tpu.pipeline_mode<synchronous>, transform_indices = @transform_6, window_bounds = array<i64: 12, 1, 8>}, {pipeline_mode = #tpu.pipeline_mode<synchronous>, transform_indices = @transform_7, window_bounds = array<i64: 6, 32>}, {transform_indices = @transform_8, window_bounds = array<i64: 1, 8, 32>}]} {
    %c0 = arith.constant 0 : index
    %c0_0 = arith.constant 0 : index
    %0 = vector.load %arg8[%c0, %c0_0] : memref<6x32xf32, #tpu.memory_space<vmem>>, vector<6x32xf32>
    %1 = vector.extract_strided_slice %0 {offsets = [0, 0], sizes = [1, 32], strides = [1, 1]} : vector<6x32xf32> to vector<1x32xf32>
    %2 = vector.extract_strided_slice %0 {offsets = [1, 0], sizes = [1, 32], strides = [1, 1]} : vector<6x32xf32> to vector<1x32xf32>
    %3 = vector.extract_strided_slice %0 {offsets = [2, 0], sizes = [1, 32], strides = [1, 1]} : vector<6x32xf32> to vector<1x32xf32>
    %4 = vector.extract_strided_slice %0 {offsets = [3, 0], sizes = [1, 32], strides = [1, 1]} : vector<6x32xf32> to vector<1x32xf32>
    %5 = vector.extract_strided_slice %0 {offsets = [4, 0], sizes = [1, 32], strides = [1, 1]} : vector<6x32xf32> to vector<1x32xf32>
    %6 = vector.extract_strided_slice %0 {offsets = [5, 0], sizes = [1, 32], strides = [1, 1]} : vector<6x32xf32> to vector<1x32xf32>
    %c0_1 = arith.constant 0 : index
    %c0_2 = arith.constant 0 : index
    %c0_3 = arith.constant 0 : index
    %7 = vector.load %arg1[%c0_1, %c0_2, %c0_3] : memref<1x8x1xi32, #tpu.memory_space<vmem>>, vector<1x8x1xi32>
    %8 = vector.shape_cast %7 : vector<1x8x1xi32> to vector<8x1xi32>
    %9 = tpu.iota {dimensions = array<i32: 1>} : vector<8x64xi32>
    %10 = vector.broadcast %8 : vector<8x1xi32> to vector<8x64xi32>
    %11 = arith.cmpi eq, %9, %10 : vector<8x64xi32>
    %12 = arith.extui %11 : vector<8x64xi1> to vector<8x64xi32>
    %13 = arith.sitofp %12 : vector<8x64xi32> to vector<8x64xf32>
    %c0_4 = arith.constant 0 : index
    %c0_5 = arith.constant 0 : index
    %14 = vector.load %arg2[%c0_4, %c0_5] : memref<64x32xf32, #tpu.memory_space<vmem>>, vector<64x32xf32>
    %cst = arith.constant dense<0.000000e+00> : vector<8x32xf32>
    %15 = tpu.matmul %13, %14, %cst {dimension_numbers = #tpu.dot_dimension_numbers<[1], [0], [0], [1], [0, 0, 1, 1], [], []>} : vector<8x64xf32>, vector<64x32xf32>, vector<8x32xf32> -> vector<8x32xf32>
    %c0_6 = arith.constant 0 : index
    %c0_7 = arith.constant 0 : index
    %16 = vector.load %arg3[%c0_6, %c0_7] : memref<8x32xf32, #tpu.memory_space<vmem>>, vector<8x32xf32>
    %17 = arith.addf %15, %16 : vector<8x32xf32>
    %18 = vector.broadcast %3 : vector<1x32xf32> to vector<8x32xf32>
    %19 = arith.addf %17, %18 : vector<8x32xf32>
    %cst_8 = arith.constant dense<0.000000e+00> : vector<8xf32>
    %20 = vector.multi_reduction <add>, %19, %cst_8 [1] : vector<8x32xf32> to vector<8xf32>
    %21 = vector.shape_cast %20 : vector<8xf32> to vector<8x1xf32>
    %cst_9 = arith.constant 3.200000e+01 : f32
    %22 = vector.broadcast %cst_9 : f32 to vector<8x1xf32>
    %23 = arith.divf %21, %22 : vector<8x1xf32>
    %24 = vector.broadcast %23 : vector<8x1xf32> to vector<8x32xf32>
    %25 = arith.subf %19, %24 : vector<8x32xf32>
    %26 = vector.broadcast %23 : vector<8x1xf32> to vector<8x32xf32>
    %27 = arith.subf %19, %26 : vector<8x32xf32>
    %28 = arith.mulf %25, %27 : vector<8x32xf32>
    %cst_10 = arith.constant dense<0.000000e+00> : vector<8xf32>
    %29 = vector.multi_reduction <add>, %28, %cst_10 [1] : vector<8x32xf32> to vector<8xf32>
    %30 = vector.shape_cast %29 : vector<8xf32> to vector<8x1xf32>
    %cst_11 = arith.constant 3.200000e+01 : f32
    %31 = vector.broadcast %cst_11 : f32 to vector<8x1xf32>
    %32 = arith.divf %30, %31 : vector<8x1xf32>
    %33 = vector.broadcast %23 : vector<8x1xf32> to vector<8x32xf32>
    %34 = arith.subf %19, %33 : vector<8x32xf32>
    %cst_12 = arith.constant 9.99999996E-13 : f32
    %35 = vector.broadcast %cst_12 : f32 to vector<8x1xf32>
    %36 = arith.addf %32, %35 : vector<8x1xf32>
    %37 = math.rsqrt %36 : vector<8x1xf32>
    %38 = vector.broadcast %37 : vector<8x1xf32> to vector<8x32xf32>
    %39 = arith.mulf %34, %38 : vector<8x32xf32>
    %40 = vector.broadcast %1 : vector<1x32xf32> to vector<8x32xf32>
    %41 = arith.mulf %39, %40 : vector<8x32xf32>
    %42 = vector.broadcast %2 : vector<1x32xf32> to vector<8x32xf32>
    %43 = arith.addf %41, %42 : vector<8x32xf32>
    %44 = arith.truncf %43 : vector<8x32xf32> to vector<8x32xbf16>
    %45 = vector.shape_cast %44 : vector<8x32xbf16> to vector<1x8x32xbf16>
    %46 = vector.shape_cast %45 : vector<1x8x32xbf16> to vector<1x8x32xbf16>
    %47 = vector.broadcast %46 : vector<1x8x32xbf16> to vector<4x8x32xbf16>
    %c0_13 = arith.constant 0 : index
    %c0_14 = arith.constant 0 : index
    %c0_15 = arith.constant 0 : index
    %48 = vector.load %arg5[%c0_13, %c0_14, %c0_15] : memref<12x32x8xbf16, #tpu.memory_space<vmem>>, vector<12x32x8xbf16>
    %c0_16 = arith.constant 0 : index
    %c0_17 = arith.constant 0 : index
    %c0_18 = arith.constant 0 : index
    %49 = vector.load %arg7[%c0_16, %c0_17, %c0_18] : memref<12x1x8xf32, #tpu.memory_space<vmem>>, vector<12x1x8xf32>
    %50 = vector.extract_strided_slice %48 {offsets = [0, 0, 0], sizes = [4, 32, 8], strides = [1, 1, 1]} : vector<12x32x8xbf16> to vector<4x32x8xbf16>
    %51 = vector.extract_strided_slice %48 {offsets = [4, 0, 0], sizes = [4, 32, 8], strides = [1, 1, 1]} : vector<12x32x8xbf16> to vector<4x32x8xbf16>
    %52 = vector.extract_strided_slice %48 {offsets = [8, 0, 0], sizes = [4, 32, 8], strides = [1, 1, 1]} : vector<12x32x8xbf16> to vector<4x32x8xbf16>
    %53 = vector.extract_strided_slice %49 {offsets = [0, 0, 0], sizes = [4, 1, 8], strides = [1, 1, 1]} : vector<12x1x8xf32> to vector<4x1x8xf32>
    %54 = vector.extract_strided_slice %49 {offsets = [4, 0, 0], sizes = [4, 1, 8], strides = [1, 1, 1]} : vector<12x1x8xf32> to vector<4x1x8xf32>
    %55 = vector.extract_strided_slice %49 {offsets = [8, 0, 0], sizes = [4, 1, 8], strides = [1, 1, 1]} : vector<12x1x8xf32> to vector<4x1x8xf32>
    "tpu.trace_start"() <{level = 10 : i32, message = "nsh,nhd->nsd"}> : () -> ()
    %cst_19 = arith.constant dense<0.000000e+00> : vector<4x8x8xf32>
    %56 = tpu.matmul %47, %50, %cst_19 {dimension_numbers = #tpu.dot_dimension_numbers<[2], [1], [1], [2], [0, 0, 0, 1, 1, 2], [0], [0]>} : vector<4x8x32xbf16>, vector<4x32x8xbf16>, vector<4x8x8xf32> -> vector<4x8x8xf32>
    "tpu.trace_stop"() : () -> ()
    %57 = vector.broadcast %53 : vector<4x1x8xf32> to vector<4x8x8xf32>
    %58 = arith.addf %56, %57 : vector<4x8x8xf32>
    "tpu.trace_start"() <{level = 10 : i32, message = "nsh,nhd->nsd"}> : () -> ()
    %cst_20 = arith.constant dense<0.000000e+00> : vector<4x8x8xf32>
    %59 = tpu.matmul %47, %51, %cst_20 {dimension_numbers = #tpu.dot_dimension_numbers<[2], [1], [1], [2], [0, 0, 0, 1, 1, 2], [0], [0]>} : vector<4x8x32xbf16>, vector<4x32x8xbf16>, vector<4x8x8xf32> -> vector<4x8x8xf32>
    "tpu.trace_stop"() : () -> ()
    %60 = vector.broadcast %54 : vector<4x1x8xf32> to vector<4x8x8xf32>
    %61 = arith.addf %59, %60 : vector<4x8x8xf32>
    "tpu.trace_start"() <{level = 10 : i32, message = "nsh,nhd->nsd"}> : () -> ()
    %cst_21 = arith.constant dense<0.000000e+00> : vector<4x8x8xf32>
    %62 = tpu.matmul %47, %52, %cst_21 {dimension_numbers = #tpu.dot_dimension_numbers<[2], [1], [1], [2], [0, 0, 0, 1, 1, 2], [0], [0]>} : vector<4x8x32xbf16>, vector<4x32x8xbf16>, vector<4x8x8xf32> -> vector<4x8x8xf32>
    "tpu.trace_stop"() : () -> ()
    %63 = vector.broadcast %55 : vector<4x1x8xf32> to vector<4x8x8xf32>
    %64 = arith.addf %62, %63 : vector<4x8x8xf32>
    %65 = arith.truncf %58 : vector<4x8x8xf32> to vector<4x8x8xbf16>
    %66 = arith.truncf %61 : vector<4x8x8xf32> to vector<4x8x8xbf16>
    "tpu.trace_start"() <{level = 10 : i32, message = "nqd,nkd->nqk"}> : () -> ()
    %cst_22 = arith.constant dense<0.000000e+00> : vector<4x8x8xf32>
    %67 = tpu.matmul %65, %66, %cst_22 {dimension_numbers = #tpu.dot_dimension_numbers<[2], [2], [1], [1], [0, 0, 0, 1, 1, 1], [0], [0]>} : vector<4x8x8xbf16>, vector<4x8x8xbf16>, vector<4x8x8xf32> -> vector<4x8x8xf32>
    "tpu.trace_stop"() : () -> ()
    %cst_23 = arith.constant 0.353553385 : f32
    %68 = vector.broadcast %cst_23 : f32 to vector<4x8x8xf32>
    %69 = arith.mulf %67, %68 : vector<4x8x8xf32>
    %c0_24 = arith.constant 0 : index
    %c0_25 = arith.constant 0 : index
    %c0_26 = arith.constant 0 : index
    %70 = vector.load %arg4[%c0_24, %c0_25, %c0_26] : memref<1x1x8xf32, #tpu.memory_space<vmem>>, vector<1x1x8xf32>
    %71 = vector.shape_cast %70 : vector<1x1x8xf32> to vector<1x8xf32>
    %72 = vector.shape_cast %71 : vector<1x8xf32> to vector<1x1x8xf32>
    %73 = vector.broadcast %72 : vector<1x1x8xf32> to vector<4x8x8xf32>
    %74 = arith.addf %69, %73 : vector<4x8x8xf32>
    %cst_27 = arith.constant dense<0xFF800000> : vector<4x8xf32>
    %75 = vector.multi_reduction <maximumf>, %74, %cst_27 [2] : vector<4x8x8xf32> to vector<4x8xf32>
    %76 = vector.shape_cast %75 : vector<4x8xf32> to vector<4x8x1xf32>
    %77 = vector.broadcast %76 : vector<4x8x1xf32> to vector<4x8x8xf32>
    %78 = arith.subf %74, %77 : vector<4x8x8xf32>
    %79 = math.exp %78 : vector<4x8x8xf32>
    %cst_28 = arith.constant dense<0.000000e+00> : vector<4x8xf32>
    %80 = vector.multi_reduction <add>, %79, %cst_28 [2] : vector<4x8x8xf32> to vector<4x8xf32>
    %81 = vector.shape_cast %80 : vector<4x8xf32> to vector<4x8x1xf32>
    %82 = tpu.reciprocal %81 {approx = true} : vector<4x8x1xf32> -> vector<4x8x1xf32>
    %83 = vector.broadcast %82 : vector<4x8x1xf32> to vector<4x8x8xf32>
    %84 = arith.mulf %79, %83 : vector<4x8x8xf32>
    %85 = arith.truncf %84 : vector<4x8x8xf32> to vector<4x8x8xbf16>
    %86 = arith.truncf %64 : vector<4x8x8xf32> to vector<4x8x8xbf16>
    "tpu.trace_start"() <{level = 10 : i32, message = "nqk,nkd->nqd"}> : () -> ()
    %cst_29 = arith.constant dense<0.000000e+00> : vector<4x8x8xf32>
    %87 = tpu.matmul %85, %86, %cst_29 {dimension_numbers = #tpu.dot_dimension_numbers<[2], [1], [1], [2], [0, 0, 0, 1, 1, 2], [0], [0]>} : vector<4x8x8xbf16>, vector<4x8x8xbf16>, vector<4x8x8xf32> -> vector<4x8x8xf32>
    "tpu.trace_stop"() : () -> ()
    %88 = arith.truncf %87 : vector<4x8x8xf32> to vector<4x8x8xbf16>
    %c0_30 = arith.constant 0 : index
    %c0_31 = arith.constant 0 : index
    %c0_32 = arith.constant 0 : index
    %89 = vector.load %arg6[%c0_30, %c0_31, %c0_32] : memref<4x8x32xbf16, #tpu.memory_space<vmem>>, vector<4x8x32xbf16>
    "tpu.trace_start"() <{level = 10 : i32, message = "nsd,ndh->nsh"}> : () -> ()
    %cst_33 = arith.constant dense<0.000000e+00> : vector<4x8x32xf32>
    %90 = tpu.matmul %88, %89, %cst_33 {dimension_numbers = #tpu.dot_dimension_numbers<[2], [1], [1], [2], [0, 0, 0, 1, 1, 2], [0], [0]>} : vector<4x8x8xbf16>, vector<4x8x32xbf16>, vector<4x8x32xf32> -> vector<4x8x32xf32>
    "tpu.trace_stop"() : () -> ()
    %cst_34 = arith.constant dense<0.000000e+00> : vector<8x32xf32>
    %91 = vector.multi_reduction <add>, %90, %cst_34 [0] : vector<4x8x32xf32> to vector<8x32xf32>
    %92 = vector.broadcast %4 : vector<1x32xf32> to vector<8x32xf32>
    %93 = arith.addf %91, %92 : vector<8x32xf32>
    %94 = arith.addf %93, %43 : vector<8x32xf32>
    %cst_35 = arith.constant dense<0.000000e+00> : vector<8xf32>
    %95 = vector.multi_reduction <add>, %94, %cst_35 [1] : vector<8x32xf32> to vector<8xf32>
    %96 = vector.shape_cast %95 : vector<8xf32> to vector<8x1xf32>
    %cst_36 = arith.constant 3.200000e+01 : f32
    %97 = vector.broadcast %cst_36 : f32 to vector<8x1xf32>
    %98 = arith.divf %96, %97 : vector<8x1xf32>
    %99 = vector.broadcast %98 : vector<8x1xf32> to vector<8x32xf32>
    %100 = arith.subf %94, %99 : vector<8x32xf32>
    %101 = vector.broadcast %98 : vector<8x1xf32> to vector<8x32xf32>
    %102 = arith.subf %94, %101 : vector<8x32xf32>
    %103 = arith.mulf %100, %102 : vector<8x32xf32>
    %cst_37 = arith.constant dense<0.000000e+00> : vector<8xf32>
    %104 = vector.multi_reduction <add>, %103, %cst_37 [1] : vector<8x32xf32> to vector<8xf32>
    %105 = vector.shape_cast %104 : vector<8xf32> to vector<8x1xf32>
    %cst_38 = arith.constant 3.200000e+01 : f32
    %106 = vector.broadcast %cst_38 : f32 to vector<8x1xf32>
    %107 = arith.divf %105, %106 : vector<8x1xf32>
    %108 = vector.broadcast %98 : vector<8x1xf32> to vector<8x32xf32>
    %109 = arith.subf %94, %108 : vector<8x32xf32>
    %cst_39 = arith.constant 9.99999996E-13 : f32
    %110 = vector.broadcast %cst_39 : f32 to vector<8x1xf32>
    %111 = arith.addf %107, %110 : vector<8x1xf32>
    %112 = math.rsqrt %111 : vector<8x1xf32>
    %113 = vector.broadcast %112 : vector<8x1xf32> to vector<8x32xf32>
    %114 = arith.mulf %109, %113 : vector<8x32xf32>
    %115 = vector.broadcast %5 : vector<1x32xf32> to vector<8x32xf32>
    %116 = arith.mulf %114, %115 : vector<8x32xf32>
    %117 = vector.broadcast %6 : vector<1x32xf32> to vector<8x32xf32>
    %118 = arith.addf %116, %117 : vector<8x32xf32>
    %c0_40 = arith.constant 0 : index
    %c0_41 = arith.constant 0 : index
    %c0_42 = arith.constant 0 : index
    %119 = vector.load %arg9[%c0_40, %c0_41, %c0_42] : memref<1x8x32xf32, #tpu.memory_space<vmem>>, vector<1x8x32xf32>
    %120 = vector.shape_cast %119 : vector<1x8x32xf32> to vector<8x32xf32>
    %121 = vector.shape_cast %118 : vector<8x32xf32> to vector<1x8x32xf32>
    tpu.vector_store %arg9[%c0_40, %c0_41, %c0_42], %121 {strides = array<i32>} : memref<1x8x32xf32, #tpu.memory_space<vmem>>, vector<1x8x32xf32>,
    return
  }
  func.func @transform_0(%arg0: i32) -> (i32, i32, i32) {
    %c0_i32 = arith.constant 0 : i32
    %c0_i32_0 = arith.constant 0 : i32
    %c0_i32_1 = arith.constant 0 : i32
    return %arg0, %c0_i32, %c0_i32_0 : i32, i32, i32
  }
  func.func @transform_1(%arg0: i32) -> (i32, i32) {
    %c0_i32 = arith.constant 0 : i32
    %c0_i32_0 = arith.constant 0 : i32
    %c0_i32_1 = arith.constant 0 : i32
    return %c0_i32, %c0_i32_0 : i32, i32
  }
  func.func @transform_2(%arg0: i32) -> (i32, i32) {
    %c0_i32 = arith.constant 0 : i32
    %c0_i32_0 = arith.constant 0 : i32
    %c0_i32_1 = arith.constant 0 : i32
    return %c0_i32, %c0_i32_0 : i32, i32
  }
  func.func @transform_3(%arg0: i32) -> (i32, i32, i32) {
    %c0_i32 = arith.constant 0 : i32
    %c0_i32_0 = arith.constant 0 : i32
    %c0_i32_1 = arith.constant 0 : i32
    return %arg0, %c0_i32, %c0_i32_0 : i32, i32, i32
  }
  func.func @transform_4(%arg0: i32) -> (i32, i32, i32) {
    %c0_i32 = arith.constant 0 : i32
    %c0_i32_0 = arith.constant 0 : i32
    %c0_i32_1 = arith.constant 0 : i32
    %c0_i32_2 = arith.constant 0 : i32
    return %c0_i32, %c0_i32_0, %c0_i32_1 : i32, i32, i32
  }
  func.func @transform_5(%arg0: i32) -> (i32, i32, i32) {
    %c0_i32 = arith.constant 0 : i32
    %c0_i32_0 = arith.constant 0 : i32
    %c0_i32_1 = arith.constant 0 : i32
    %c0_i32_2 = arith.constant 0 : i32
    return %c0_i32, %c0_i32_0, %c0_i32_1 : i32, i32, i32
  }
  func.func @transform_6(%arg0: i32) -> (i32, i32, i32) {
    %c0_i32 = arith.constant 0 : i32
    %c0_i32_0 = arith.constant 0 : i32
    %c0_i32_1 = arith.constant 0 : i32
    %c0_i32_2 = arith.constant 0 : i32
    return %c0_i32, %c0_i32_0, %c0_i32_1 : i32, i32, i32
  }
  func.func @transform_7(%arg0: i32) -> (i32, i32) {
    %c0_i32 = arith.constant 0 : i32
    %c0_i32_0 = arith.constant 0 : i32
    %c0_i32_1 = arith.constant 0 : i32
    return %c0_i32, %c0_i32_0 : i32, i32
  }
  func.func @transform_8(%arg0: i32) -> (i32, i32, i32) {
    %c0_i32 = arith.constant 0 : i32
    %c0_i32_0 = arith.constant 0 : i32
    %c0_i32_1 = arith.constant 0 : i32
    return %arg0, %c0_i32, %c0_i32_0 : i32, i32, i32
  }
}

</mosaic_0001>

<bundles_post_ra>
// kernel: tpu_custom_call.1
= control target key start
LH: loop header
LB: loop body
LE: loop exit
PB: predicated region body
PF: predicated region fallthrough
CT: control target
= control target key end

     0   :  { %13 = vsyncpa [#allocation3], 0  ;;  %s2936_s0 = inlined_call_operand.vmem [shape: s32[2,8,1], index: 0, kind: input, shape index: {}]   ;;  %s2937_s1 = inlined_call_operand.vmem [shape: f32[64,32], index: 1, kind: input, shape index: {}]   ;;  %s2938_s2 = inlined_call_operand.vmem [shape: f32[8,32], index: 2, kind: input, shape index: {}]   ;;  %s2939_s3 = inlined_call_operand.vmem [shape: f32[2,1,8], index: 3, kind: input, shape index: {}]   ;;  %s2940_s4 = inlined_call_operand.vmem [shape: bf16[12,32,8], index: 4, kind: input, shape index: {}]   ;;  %s2941_s5 = inlined_call_operand.vmem [shape: bf16[4,8,32], index: 5, kind: input, shape index: {}]   ;;  %s2942_s6 = inlined_call_operand.vmem [shape: f32[12,1,8], index: 6, kind: input, shape index: {}]   ;;  %s2943_s7 = inlined_call_operand.vmem [shape: f32[6,32], index: 7, kind: input, shape index: {}]   ;;  %s2944_s8 = inlined_call_operand.hbm [shape: f32[2,8,32], index: 8, kind: output, shape index: {}]  }
   0x1   :  { %15 = vsyncpa [#allocation3 + $0x1], 0  ;;  %s2498_s27 = smov 0   ;;  %s2500_s28 = smov 0  }
   0x2   :  { %s2502_s29 = smov 0   ;;  %s2504_s30 = smov 0  }
   0x3 LB: > { %s2519_s9 = sadd.s32 4294967295, %s2446_s30   ;;  %s1955_s10 = sadd.s32 4294967294, %s2446_s30   ;;  %s2446_s30 = sphi %s2504_s30, %s2950_s30   ;;  %s2442_s29 = sphi %s2502_s29, %s2949_s29   ;;  %s2438_s28 = sphi %s2500_s28, %s2948_s28   ;;  %s2434_s27 = sphi %s2498_s27, %s2947_s27  }
   0x4   : > { %s2523_s11 = sadd.s32 1, %s2446_s30   ;;  %s206_s12 = sadd.s32 1, %s2442_s29 }
   0x5   : > { %s203_s13 = ssub.s32 %s2446_s30, %s2523_s11  ;;  %p216_p0 = scmp.ne.s32.totalorder %s2442_s29, %s2438_s28 }
   0x6   : > { %p204_p1 = scmp.eq.s32.totalorder %s203_s13, 0  ;;  %p217_p2 = scmp.eq.s32.totalorder %s2519_s9, 1 }
   0x7   : > { %p222_p3 = scmp.ne.s32.totalorder %s2438_s28, %s2434_s27  ;;  %p223_p4 = scmp.eq.s32.totalorder %s1955_s10, 1 }
   0x8   : > { %s2534_s14 = scalar_select %p204_p1, %s2442_s29, %s206_s12  }
   0x9   : > { %p2536_p5 = por %p217_p2, %p216_p0  ;;  %p2540_p6 = por %p223_p4, %p222_p3 }
   0xa   : > { %p1958_p7 = scmp.ge.s32.totalorder %s2446_s30, 1  ;;  %p272_p8 = scmp.lt.s32.totalorder %s2446_s30, 3 }
   0xc   : > { %p273_p9 = pnand %p1958_p7, %p272_p8 }
   0xd   : > { %p308_p10 = scmp.lt.s32.totalorder (!%p273_p9), %s2519_s9, 1  ;;  %v326_v0 = vld [vmem:[%s2937_s1] sm:$0xff] (!%p273_p9)  ;;  %v327_v1 = vld [vmem:[%s2937_s1 + $0x8] sm:$0xff] (!%p273_p9)  ;;  %v328_v2 = vld [vmem:[%s2937_s1 + $0x10] sm:$0xff] (!%p273_p9)  ;;  %v2448_v3 = vmov (!%p273_p9), 0   ;;  %v2449_v4 = vmov (!%p273_p9), 0.0|0.0   ;;  %v318_v16 = vlaneseq (!%p273_p9) }
   0xe   : > { %276 = sbr.rel (%p273_p9) target bundleno = 2235 (0x8bb), region = 52  ;;  %2339 = vset.pattern.permute.xlu0 (!%p273_p9), %v2448_v3  ;;  %2284 = vmatprep.subr.bf16.mxu0 (!%p273_p9), %v2449_v4  ;;  %v2285_v5 = vpack.c.bf16 (!%p273_p9), %v327_v1, %v326_v0  ;;  %v329_v6 = vld [vmem:[%s2937_s1 + $0x18] sm:$0xff] (!%p273_p9)  ;;  %v330_v7 = vld [vmem:[%s2937_s1 + $0x20] sm:$0xff] (!%p273_p9)  ;;  %v2450_v8 = vmov (!%p273_p9), 0.0   ;;  %v331_v10 = vld [vmem:[%s2937_s1 + $0x28] sm:$0xff] (!%p273_p9)  ;;  %vm2451_vm0 = vmmov (!%p273_p9), 0  }
   0xf   : > { %2116 = vmatprep.subr.bf16.mxu1 (!%p273_p9), %v2450_v8  ;;  %v2288_v9 = vpack.c.bf16 (!%p273_p9), %v329_v6, %v328_v2  ;;  %v2291_v12 = vpack.c.bf16 (!%p273_p9), %v331_v10, %v330_v7  ;;  %v332_v13 = vld [vmem:[%s2937_s1 + $0x30] sm:$0xff] (!%p273_p9)  ;;  %v333_v14 = vld [vmem:[%s2937_s1 + $0x38] sm:$0xff] (!%p273_p9)  ;;  %2113 = vmatprep.mubr.msk.f32.mxu0 (!%p273_p9), %vm2451_vm0, %v2450_v8  ;;  %v319_v17 = vand.u32 (!%p273_p9), 127, %v318_v16  ;;  %vm335_vm1 = vcmask (!%p273_p9), 523264   ;;  %v2593_v22 = vld [vmem:[%s2943_s7] sm:$0x3f] (!%p273_p9) }
  0x10   : > { %2286 = vmatpush3.bf16.msra.mxu0 (!%p273_p9), %v2285_v5  ;;  %2120 = vmatprep.mubr.msk.bf16.mxu1 (!%p273_p9), %vm2451_vm0, %v2450_v8  ;;  %v2294_v15 = vpack.c.bf16 (!%p273_p9), %v333_v14, %v332_v13  ;;  %v2587_v20 = vshrl.u32 (!%p273_p9), %v318_v16, 7  ;;  %v334_v23 = vld [vmem:[%s2938_s2] sm:$0xff] (!%p273_p9)  ;;  %vm414_vm3 = vcmask (!%p273_p9), 261120   ;;  %v2342_v37 = vld [vmem:[%s2940_s4 + $0x8] sm:$0xff] (!%p273_p9)   ;;  %v2344_v50 = vld [vmem:[%s2940_s4 + $0x10] sm:$0xff] (!%p273_p9)   ;;  %vm1207_vm4 = vcmask (!%p273_p9), 64512  }
  0x11   : > { %2287 = vmatprep.subr.bf16.mxu0 (!%p273_p9), %v2449_v4  ;;  %v2340_v35 = vld [vmem:[%s2940_s4] sm:$0xff] (!%p273_p9)   ;;  %v2343_v38 = vld [vmem:[%s2940_s4 + $0x28] sm:$0xff] (!%p273_p9)   ;;  %v2346_v53 = vld [vmem:[%s2940_s4 + $0x18] sm:$0xff] (!%p273_p9)   ;;  %vm1462_vm5 = vcmask (!%p273_p9), 1043456   ;;  %s2025_s13 = sshll.u32 (!%p273_p9), %s2519_s9, 7 }
  0x12   : > { %v411_v21 = vsub.s32 (!%p273_p9), 2, %v2587_v20  ;;  %v2341_v36 = vld [vmem:[%s2940_s4 + $0x20] sm:$0xff] (!%p273_p9)   ;;  %2117 = vmatpush3.bf16.msra.mxu1 (!%p273_p9), %v2340_v35  ;;  %v431_v42 = vsub.s32 (!%p273_p9), 0, %v2587_v20  ;;  %v436_v43 = vsub.s32 (!%p273_p9), 1, %v2587_v20  ;;  %v2347_v54 = vld [vmem:[%s2940_s4 + $0x48] sm:$0xff] (!%p273_p9)   ;;  %v2348_v55 = vld [vmem:[%s2940_s4 + $0x30] sm:$0xff] (!%p273_p9)   ;;  %s2893_s21 = scalar_lea.hbm (!%p273_p9), %s2944_s8, %s2025_s13 }
  0x13   : > { %2118 = vmatprep.subr.bf16.mxu1 (!%p273_p9), %v2450_v8  ;;  %v2345_v51 = vld [vmem:[%s2940_s4 + $0x40] sm:$0xff] (!%p273_p9)   ;;  %v2350_v57 = vld [vmem:[%s2940_s4 + $0x38] sm:$0xff] (!%p273_p9)   ;;  %v2351_v58 = vld [vmem:[%s2940_s4 + $0x68] sm:$0xff] (!%p273_p9)  }
  0x14   : > { %2289 = vmatpush3.bf16.msra.mxu0 (!%p273_p9), %v2288_v9  ;;  %v412_v24 = vrot.slane (!%p273_p9), %v2593_v22, %v411_v21  ;;  %v432_v44 = vrot.slane (!%p273_p9), %v2593_v22, %v431_v42  ;;  %v437_v46 = vrot.slane (!%p273_p9), %v2593_v22, %v436_v43  ;;  %v2349_v56 = vld [vmem:[%s2940_s4 + $0x60] sm:$0xff] (!%p273_p9)   ;;  %v2352_v59 = vld [vmem:[%s2940_s4 + $0x50] sm:$0xff] (!%p273_p9)   ;;  %v2354_v61 = vld [vmem:[%s2940_s4 + $0x58] sm:$0xff] (!%p273_p9)  }
  0x15   : > { %s2560_s25 = scalar_select %p308_p10, %s2519_s9, 1  ;;  %2290 = vmatprep.subr.bf16.mxu0 %v2449_v4  ;;  %v2353_v60 = vld [vmem:[%s2940_s4 + $0x80] sm:$0xff]   ;;  %v2355_v62 = vld [vmem:[%s2940_s4 + $0x88] sm:$0xff]   ;;  %v2356_v63 = vld [vmem:[%s2940_s4 + $0x70] sm:$0xff]  }
  0x16   : > { %2119 = vmatpush3.bf16.msra.mxu1 %v2342_v37  ;;  %v2357_v0 = vld [vmem:[%s2940_s4 + $0xa0] sm:$0xff]   ;;  %v2358_v1 = vld [vmem:[%s2940_s4 + $0x78] sm:$0xff]   ;;  %v2359_v2 = vld [vmem:[%s2940_s4 + $0xa8] sm:$0xff]   ;;  %s2452_s9 = smov [#allocation2]  }
  0x17   : > { %s1960_s12 = sshll.u32 %s2560_s25, 3  ;;  %2124 = vmatprep.subr.bf16.mxu1 %v2450_v8  ;;  %v2360_v3 = vld [vmem:[%s2940_s4 + $0x90] sm:$0xff]   ;;  %v2363_v6 = vld [vmem:[%s2940_s4 + $0xb8] sm:$0xff]   ;;  %v1979_v16 = vld [vmem:[%s2942_s6 + $0x4] ss:$0 sm:$0xff]  ;;  %s2388_s24 = sshll.u32 %s2452_s9, 4  ;;  %s2389_s24 = int_to_ptr.vmem [resolvable:$false] %s2388_s24 }
  0x18   : > { %s311_s20 = scalar_lea.vmem %s2936_s0, %s1960_s12  ;;  %2292 = vmatpush3.bf16.msra.mxu0 %v2291_v12  ;;  %v2362_v5 = vld [vmem:[%s2940_s4 + $0xb0] sm:$0xff]   ;;  %s314_s12 = scalar_lea.vmem %s2939_s3, %s2560_s25 }
  0x19   : > { %v317_v11 = vld [vmem:[%s311_s20] sm:$0xff]  ;;  %2293 = vmatprep.subr.bf16.mxu0 %v2449_v4  ;;  %v2361_v4 = vld [vmem:[%s2940_s4 + $0x98] sm:$0xff]   ;;  %s2390_s26 = scalar_lea.vmem %s2389_s24, 256 }
  0x1a   : > { %321 = vperm.xlu0 %2339, %v317_v11  }
  0x1c   : > { %2295 = vmatpush3.bf16.msra.mxu0 %v2294_v15 }
  0x1d   : > { %2132 = vmatprep.subr.bf16.mxu0 %v2450_v8 }
  0x99   : > { %v322_v18 = vpop.permute.xlu0 %321 }
  0x9a   : > { %vm323_vm2 = vcmp.eq.s32.totalorder %v319_v17, %v322_v18 }
  0x9b   : > { %v1961_v19 = vsel %vm323_vm2, 1.0, %v2450_v8 }
  0x9c   : > { %2114 = vmatmul.mubr.msk.f32.vlgmr.msra.gmra.mrb[0].mxu0 %vm335_vm1, %v1961_v19 }
  0x9d   : > { %2136 = vmatprep.mubr.msk.bf16.mxu0 %vm2451_vm0, %v2450_v8  ;;  %2133 = vmatpush3.bf16.msra.mxu0 %v2341_v36 }
  0x9e   : > { %2134 = vmatprep.subr.bf16.mxu0 %v2450_v8 }
  0xa1   : > { %2135 = vmatpush3.bf16.msra.mxu0 %v2343_v38 }
  0xa2   : > { %2148 = vmatprep.subr.bf16.mxu0 %v2450_v8 }
 0x16f   : > { %v405_v25 = vpop.f32.mrb[0].mxu0 }
 0x170   : > { %v406_v26 = vadd.f32 %v405_v25, %v334_v23  ;;  %v2115_v27 = vpop.f32.mrb[1].mxu0 }
 0x172   : > { %v413_v28 = vadd.f32 %v412_v24, %v406_v26 }
 0x174   : > { %v415_v29 = vsel %vm414_vm3, %v413_v28, 0.0 }
 0x175   : > { %416 = vadd.xlane.f32.xlu0 %v415_v29  ;;  %v1963_v29 = vld [vmem:[%s2942_s6] ss:$0 sm:$0xff] }
 0x202   : > { %v417_v30 = vpop.xlane.xlu0 %416 }
 0x203   : > { %v419_v31 = vmul.f32 0.03125, %v417_v30 }
 0x205   : > { %v420_v32 = vsub.f32 %v413_v28, %v419_v31  ;;  %v1981_v31 = vld [vmem:[%s2942_s6 + $0x6] ss:$0 sm:$0xff] }
 0x207   : > { %v421_v33 = vmul.f32 %v420_v32, %v420_v32 }
 0x209   : > { %v422_v34 = vsel %vm414_vm3, %v421_v33, 0.0 }
 0x20a   : > { %423 = vadd.xlane.f32.xlu1 %v422_v34 }
 0x297   : > { %v424_v39 = vpop.xlane.xlu1 %423 }
 0x298   : > { %v425_v40 = vmul.f32 0.03125, %v424_v39 }
 0x29a   : > { %v426_v41 = vadd.f32 1e-12, %v425_v40 }
 0x29c   : > { %2364 = vrsqrt.f32 %v426_v41 }
 0x2a6   : > { %v2365_v45 = vpop.eup %2364 }
 0x2a7   : > { %v428_v47 = vmul.f32 %v2365_v45, %v420_v32 }
 0x2a9   : > { %v433_v48 = vmul.f32 %v432_v44, %v428_v47  ;;  %v1965_v44 = vld [vmem:[%s2942_s6 + $0x2] ss:$0 sm:$0xff]  ;;  %v1995_v47 = vld [vmem:[%s2942_s6 + $0x8] ss:$0 sm:$0xff] }
 0x2ab   : > { %v2621_v49 = vadd.f32 %v437_v46, %v433_v48  ;;  %v1980_v46 = vld [vmem:[%s2942_s6 + $0x5] ss:$0 sm:$0xff] }
 0x2ad   : > { %v2631_v52 = vpack.c.bf16 %v2621_v49, %v2621_v49 }
 0x2af   : > { %2121 = vmatmul.mubr.msk.bf16.vlgmr.msra.gmra.mrb[0].mxu1 %vm414_vm3, %v2631_v52  ;;  %2137 = vmatmul.mubr.msk.bf16.vlgmr.msra.gmra.mrb[4].mxu0 %vm414_vm3, %v2631_v52 }
 0x2b0   : > { %2125 = vmatpush3.bf16.msra.mxu1 %v2344_v50  ;;  %2149 = vmatpush3.bf16.msra.mxu0 %v2345_v51 }
 0x2b1   : > { %2126 = vmatprep.subr.bf16.mxu1 %v2450_v8  ;;  %2150 = vmatprep.subr.bf16.mxu0 %v2450_v8 }
 0x2b2   : > { %2128 = vmatprep.mubr.msk.bf16.mxu1 %vm2451_vm0, %v2450_v8  ;;  %2152 = vmatprep.mubr.msk.bf16.mxu0 %vm2451_vm0, %v2450_v8 }
 0x2b4   : > { %2127 = vmatpush3.bf16.msra.mxu1 %v2346_v53  ;;  %2151 = vmatpush3.bf16.msra.mxu0 %v2347_v54 }
 0x2b5   : > { %2140 = vmatprep.subr.bf16.mxu1 %v2450_v8  ;;  %2164 = vmatprep.subr.bf16.mxu0 %v2450_v8 }
 0x2b7   : > { %2129 = vmatmul.mubr.msk.bf16.vlgmr.msra.gmra.mrb[4].mxu1 %vm414_vm3, %v2631_v52  ;;  %2153 = vmatmul.mubr.msk.bf16.vlgmr.msra.gmra.mrb[8].mxu0 %vm414_vm3, %v2631_v52 }
 0x2b8   : > { %2141 = vmatpush3.bf16.msra.mxu1 %v2348_v55  ;;  %2165 = vmatpush3.bf16.msra.mxu0 %v2349_v56 }
 0x2b9   : > { %2142 = vmatprep.subr.bf16.mxu1 %v2450_v8  ;;  %2166 = vmatprep.subr.bf16.mxu0 %v2450_v8 }
 0x2ba   : > { %2144 = vmatprep.mubr.msk.bf16.mxu1 %vm2451_vm0, %v2450_v8  ;;  %2168 = vmatprep.mubr.msk.bf16.mxu0 %vm2451_vm0, %v2450_v8 }
 0x2bc   : > { %2143 = vmatpush3.bf16.msra.mxu1 %v2350_v57  ;;  %2167 = vmatpush3.bf16.msra.mxu0 %v2351_v58 }
 0x2bd   : > { %2156 = vmatprep.subr.bf16.mxu1 %v2450_v8  ;;  %2180 = vmatprep.subr.bf16.mxu0 %v2450_v8 }
 0x2bf   : > { %2145 = vmatmul.mubr.msk.bf16.vlgmr.msra.gmra.mrb[8].mxu1 %vm414_vm3, %v2631_v52  ;;  %2169 = vmatmul.mubr.msk.bf16.vlgmr.msra.gmra.mrb[12].mxu0 %vm414_vm3, %v2631_v52 }
 0x2c0   : > { %2157 = vmatpush3.bf16.msra.mxu1 %v2352_v59  ;;  %2181 = vmatpush3.bf16.msra.mxu0 %v2353_v60 }
 0x2c1   : > { %2158 = vmatprep.subr.bf16.mxu1 %v2450_v8  ;;  %2182 = vmatprep.subr.bf16.mxu0 %v2450_v8 }
 0x2c2   : > { %2160 = vmatprep.mubr.msk.bf16.mxu1 %vm2451_vm0, %v2450_v8  ;;  %2184 = vmatprep.mubr.msk.bf16.mxu0 %vm2451_vm0, %v2450_v8 }
 0x2c4   : > { %2159 = vmatpush3.bf16.msra.mxu1 %v2354_v61  ;;  %2183 = vmatpush3.bf16.msra.mxu0 %v2355_v62 }
 0x2c5   : > { %2172 = vmatprep.subr.bf16.mxu1 %v2450_v8  ;;  %2196 = vmatprep.subr.bf16.mxu0 %v2450_v8 }
 0x2c7   : > { %2161 = vmatmul.mubr.msk.bf16.vlgmr.msra.gmra.mrb[12].mxu1 %vm414_vm3, %v2631_v52  ;;  %2185 = vmatmul.mubr.msk.bf16.vlgmr.msra.gmra.mrb[16].mxu0 %vm414_vm3, %v2631_v52 }
 0x2c8   : > { %2173 = vmatpush3.bf16.msra.mxu1 %v2356_v63  ;;  %2197 = vmatpush3.bf16.msra.mxu0 %v2357_v0  ;;  %v1964_v63 = vld [vmem:[%s2942_s6 + $0x1] ss:$0 sm:$0xff] }
 0x2c9   : > { %2174 = vmatprep.subr.bf16.mxu1 %v2450_v8  ;;  %2198 = vmatprep.subr.bf16.mxu0 %v2450_v8 }
 0x2ca   : > { %2176 = vmatprep.mubr.msk.bf16.mxu1 %vm2451_vm0, %v2450_v8  ;;  %2200 = vmatprep.mubr.msk.bf16.mxu0 %vm2451_vm0, %v2450_v8 }
 0x2cc   : > { %2175 = vmatpush3.bf16.msra.mxu1 %v2358_v1  ;;  %2199 = vmatpush3.bf16.msra.mxu0 %v2359_v2  ;;  %v1982_v2 = vld [vmem:[%s2942_s6 + $0x7] ss:$0 sm:$0xff] }
 0x2cd   : > { %2188 = vmatprep.subr.bf16.mxu1 %v2450_v8  ;;  %2212 = vmatprep.subr.bf16.mxu0 %v2450_v8 }
 0x2cf   : > { %2177 = vmatmul.mubr.msk.bf16.vlgmr.msra.gmra.mrb[16].mxu1 %vm414_vm3, %v2631_v52  ;;  %2201 = vmatmul.mubr.msk.bf16.vlgmr.msra.gmra.mrb[20].mxu0 %vm414_vm3, %v2631_v52 }
 0x2d0   : > { %2189 = vmatpush3.bf16.msra.mxu1 %v2360_v3  ;;  %2192 = vmatprep.mubr.msk.bf16.mxu1 %vm2451_vm0, %v2450_v8 }
 0x2d1   : > { %2190 = vmatprep.subr.bf16.mxu1 %v2450_v8  ;;  %2214 = vmatprep.mubr.msk.bf16.mxu0 %vm2451_vm0, %v2450_v8 }
 0x2d4   : > { %2191 = vmatpush3.bf16.msra.mxu1 %v2361_v4 }
 0x2d5   : > { %2204 = vmatprep.subr.bf16.mxu1 %v2450_v8 }
 0x2d7   : > { %2193 = vmatmul.mubr.msk.bf16.vlgmr.msra.gmra.mrb[20].mxu1 %vm414_vm3, %v2631_v52 }
 0x2d8   : > { %2205 = vmatpush3.bf16.msra.mxu1 %v2362_v5  ;;  %2208 = vmatprep.mubr.msk.bf16.mxu1 %vm2451_vm0, %v2450_v8 }
 0x2d9   : > { %2206 = vmatprep.subr.bf16.mxu1 %v2450_v8 }
 0x2dc   : > { %2207 = vmatpush3.bf16.msra.mxu1 %v2363_v6 }
 0x2dd   : > { %2218 = vmatprep.subr.bf16.mxu1 %v2450_v8 }
 0x2df   : > { %2209 = vmatmul.mubr.msk.bf16.vlgmr.msra.gmra.mrb[24].mxu1 %vm414_vm3, %v2631_v52 }
 0x2e0   : > { %2220 = vmatprep.mubr.msk.bf16.mxu1 %vm2451_vm0, %v2450_v8 }
 0x382   : > { %v573_v7 = vpop.f32.mrb[0].mxu1  ;;  %v677_v9 = vpop.f32.mrb[4].mxu0 }
 0x383   : > { %v2122_v10 = vpop.f32.mrb[1].mxu1  ;;  %v2138_v11 = vpop.f32.mrb[5].mxu0  ;;  %v574_v32 = vadd.f32 %v1963_v29, %v573_v7  ;;  %v678_v48 = vadd.f32 %v1965_v44, %v677_v9 }
 0x384   : > { %v576_v12 = vpop.f32.mrb[2].mxu1  ;;  %v680_v13 = vpop.f32.mrb[6].mxu0 }
 0x385   : > { %v2123_v14 = vpop.f32.mrb[3].mxu1  ;;  %v2139_v15 = vpop.f32.mrb[7].mxu0  ;;  %v1199_v40 = vpack.c.bf16 %v574_v32, %v574_v32  ;;  %v1201_v58 = vpack.c.bf16 %v678_v48, %v678_v48 }
 0x38a   : > { %v625_v17 = vpop.f32.mrb[4].mxu1  ;;  %v805_v18 = vpop.f32.mrb[8].mxu0 }
 0x38b   : > { %v806_v19 = vadd.f32 %v1979_v16, %v805_v18  ;;  %v2130_v21 = vpop.f32.mrb[5].mxu1  ;;  %v2154_v23 = vpop.f32.mrb[9].mxu0  ;;  %v626_v3 = vadd.f32 %v1964_v63, %v625_v17  ;;  %v1966_v16 = vld [vmem:[%s2942_s6 + $0x3] ss:$0 sm:$0xff]  ;;  %v1996_v18 = vld [vmem:[%s2942_s6 + $0x9] ss:$0 sm:$0xff] }
 0x38c   : > { %v628_v24 = vpop.f32.mrb[6].mxu1  ;;  %v808_v25 = vpop.f32.mrb[10].mxu0 }
 0x38d   : > { %v1203_v26 = vpack.c.bf16 %v806_v19, %v806_v19  ;;  %v2131_v27 = vpop.f32.mrb[7].mxu1  ;;  %v2155_v28 = vpop.f32.mrb[11].mxu0  ;;  %v1200_v12 = vpack.c.bf16 %v626_v3, %v626_v3 }
 0x38f   : > { %v1212_v30 = vsel %vm1207_vm4, %v1203_v26, 0 }
 0x390   : > { %2213 = vmatpush3.bf16.xpose.msra.mxu0 %v1212_v30 }
 0x391   : > { %2224 = vmatprep.subr.bf16.mxu0 %v2450_v8 }
 0x392   : > { %v729_v33 = vpop.f32.mrb[8].mxu1  ;;  %v909_v34 = vpop.f32.mrb[12].mxu0 }
 0x393   : > { %v910_v35 = vadd.f32 %v1981_v31, %v909_v34  ;;  %v2146_v36 = vpop.f32.mrb[9].mxu1  ;;  %v2170_v37 = vpop.f32.mrb[13].mxu0  ;;  %v730_v19 = vadd.f32 %v1966_v16, %v729_v33  ;;  %v2015_v34 = vld [vmem:[%s314_s12] ss:$0 sm:$0xff]  ;;  %s305_s12 = sand.u32 1, %s2438_s28  }
 0x394   : > { %v732_v38 = vpop.f32.mrb[10].mxu1  ;;  %v912_v39 = vpop.f32.mrb[14].mxu0  ;;  %s1959_s25 = sshll.u32 %s305_s12, 3  ;;  %s1874_s22 = scalar_lea.sflag [#allocation3], %s305_s12 }
 0x395   : > { %v1205_v41 = vpack.c.bf16 %v910_v35, %v910_v35  ;;  %v2147_v42 = vpop.f32.mrb[11].mxu1  ;;  %v2171_v43 = vpop.f32.mrb[15].mxu0  ;;  %v1202_v26 = vpack.c.bf16 %v730_v19, %v730_v19  ;;  %s307_s17 = scalar_lea.vmem [#allocation2], %s1959_s25 }
 0x396   : > { %s1887_s18 = sshll.u32 %s307_s17, 4  ;;  %s2895_s18 = int_to_ptr.vmem [resolvable:$true] %s1887_s18 }
 0x397   : > { %v1304_v45 = vsel %vm1207_vm4, %v1205_v41, 0  ;;  %2215 = vmatmul.mubr.msk.bf16.vlgmr.msra.gmra.mrb[24].mxu0 %vm1207_vm4, %v1199_v40  ;;  %s2384_s23 = scalar_lea.vmem %s2895_s18, 128  ;;  %p2391_p0 = scmp.lt.s32.totalorder %s2895_s18, %s2389_s24 }
 0x398   : > { %2225 = vmatpush3.bf16.xpose.msra.mxu0 %v1304_v45  ;;  %2226 = vmatprep.mubr.msk.bf16.mxu0 %vm2451_vm0, %v2450_v8  ;;  %p2385_p11 = scmp.ne.s32.totalorder %s2895_s18, %s2384_s23  ;;  %p2392_p1 = scmp.lt.s32.totalorder %s2390_s26, %s2384_s23 }
 0x399   : > { %2236 = vmatprep.subr.bf16.mxu0 %v2450_v8 }
 0x39a   : > { %v857_v50 = vpop.f32.mrb[12].mxu1  ;;  %v1037_v51 = vpop.f32.mrb[16].mxu0  ;;  %p2386_p12 = pnand %p2385_p11, %p2536_p5  ;;  %p2393_p2 = por %p2392_p1, %p2391_p0 }
 0x39b   : > { %v858_v52 = vadd.f32 %v1980_v46, %v857_v50  ;;  %v1038_v53 = vadd.f32 %v1995_v47, %v1037_v51  ;;  %v2162_v54 = vpop.f32.mrb[13].mxu1  ;;  %v2186_v55 = vpop.f32.mrb[17].mxu0 }
 0x39c   : > { %v860_v56 = vpop.f32.mrb[14].mxu1  ;;  %v1040_v57 = vpop.f32.mrb[18].mxu0  ;;  %p2387_p13 = pneg %p2386_p12 }
 0x39d   : > { %v1204_v59 = vpack.c.bf16 %v858_v52, %v858_v52  ;;  %v1455_v60 = vpack.c.bf16 %v1038_v53, %v1038_v53  ;;  %v2163_v61 = vpop.f32.mrb[15].mxu1  ;;  %v2187_v62 = vpop.f32.mrb[19].mxu0 }
 0x39e   : > { %p2394_p3 = pnand %p2393_p2, %p2387_p13 }
 0x39f   : > { %v1258_v0 = vsel %vm1207_vm4, %v1204_v59, 0  ;;  %v1464_v1 = vsel %vm1462_vm5, %v1455_v60, 0  ;;  %2227 = vmatmul.mubr.msk.bf16.vlgmr.msra.gmra.mrb[28].mxu0 %vm1207_vm4, %v1201_v58 }
 0x3a0   : > { %2219 = vmatpush3.bf16.xpose.msra.mxu1 %v1258_v0  ;;  %2237 = vmatpush3.bf16.msra.mxu0 %v1464_v1 }
 0x3a1   : > { %2230 = vmatprep.subr.bf16.mxu1 %v2450_v8  ;;  %2238 = vmatprep.mubr.msk.bf16.mxu0 %vm2451_vm0, %v2450_v8 }
 0x3a2   : > { %v961_v4 = vpop.f32.mrb[16].mxu1  ;;  %v2792_v5 = vpop.f32.mrb[20].mxu0  ;;  %2248 = vmatprep.subr.bf16.mxu0 %v2450_v8 }
 0x3a3   : > { %v962_v6 = vadd.f32 %v1982_v2, %v961_v4  ;;  %v2178_v7 = vpop.f32.mrb[17].mxu1  ;;  %v2202_v9 = vpop.f32.mrb[21].mxu0 }
 0x3a4   : > { %v964_v10 = vpop.f32.mrb[18].mxu1  ;;  %v1144_v11 = vpop.f32.mrb[22].mxu0 }
 0x3a5   : > { %v1206_v13 = vpack.c.bf16 %v962_v6, %v962_v6  ;;  %v2179_v14 = vpop.f32.mrb[19].mxu1  ;;  %v2203_v15 = vpop.f32.mrb[23].mxu0 }
 0x3a7   : > { %v1350_v17 = vsel %vm1207_vm4, %v1206_v13, 0  ;;  %2221 = vmatmul.mubr.msk.bf16.vlgmr.msra.gmra.mrb[28].mxu1 %vm1207_vm4, %v1200_v12 }
 0x3a8   : > { %2231 = vmatpush3.bf16.xpose.msra.mxu1 %v1350_v17  ;;  %2232 = vmatprep.mubr.msk.bf16.mxu1 %vm2451_vm0, %v2450_v8 }
 0x3a9   : > { %2242 = vmatprep.subr.bf16.mxu1 %v2450_v8 }
 0x3aa   : > { %v1089_v21 = vpop.f32.mrb[20].mxu1 }
 0x3ab   : > { %v1090_v23 = vadd.f32 %v1996_v18, %v1089_v21  ;;  %v2194_v24 = vpop.f32.mrb[21].mxu1 }
 0x3ac   : > { %v1092_v25 = vpop.f32.mrb[22].mxu1 }
 0x3ad   : > { %v1456_v27 = vpack.c.bf16 %v1090_v23, %v1090_v23  ;;  %v2195_v28 = vpop.f32.mrb[23].mxu1  ;;  %v1997_v25 = vld [vmem:[%s2942_s6 + $0xa] ss:$0 sm:$0xff] }
 0x3af   : > { %v1510_v29 = vsel %vm1462_vm5, %v1456_v27, 0  ;;  %2233 = vmatmul.mubr.msk.bf16.vlgmr.msra.gmra.mrb[32].mxu1 %vm1207_vm4, %v1202_v26  ;;  %v1142_v26 = vadd.f32 %v1997_v25, %v2792_v5  ;;  %v1998_v5 = vld [vmem:[%s2942_s6 + $0xb] ss:$0 sm:$0xff] }
 0x3b0   : > { %2243 = vmatpush3.bf16.msra.mxu1 %v1510_v29  ;;  %2244 = vmatprep.mubr.msk.bf16.mxu1 %vm2451_vm0, %v2450_v8 }
 0x3b1   : > { %2254 = vmatprep.subr.bf16.mxu1 %v2450_v8  ;;  %v1457_v28 = vpack.c.bf16 %v1142_v26, %v1142_v26 }
 0x3b2   : > { %v2811_v30 = vpop.f32.mrb[24].mxu1 }
 0x3b3   : > { %v2210_v31 = vpop.f32.mrb[25].mxu1 }
 0x3b4   : > { %v1196_v32 = vpop.f32.mrb[26].mxu1 }
 0x3b5   : > { %v2211_v33 = vpop.f32.mrb[27].mxu1  ;;  %v1556_v32 = vsel %vm1462_vm5, %v1457_v28, 0 }
 0x46a   : > { %v1248_v35 = vpop.f32.mrb[24].mxu0 }
 0x46b   : > { %v1392_v36 = vmul.f32 0.35355338, %v1248_v35  ;;  %v2216_v37 = vpop.f32.mrb[25].mxu0  ;;  %v1194_v35 = vadd.f32 %v1998_v5, %v2811_v30 }
 0x46c   : > { %v1251_v38 = vpop.f32.mrb[26].mxu0 }
 0x46d   : > { %v2217_v39 = vpop.f32.mrb[27].mxu0  ;;  %v1403_v40 = vadd.f32 %v2015_v34, %v1392_v36  ;;  %v1458_v38 = vpack.c.bf16 %v1194_v35, %v1194_v35 }
 0x46f   : > { %v1407_v41 = vsel %vm1207_vm4, %v1403_v40, -inf }
 0x470   : > { %1408 = vmax.xlane.f32.xlu1 %v1407_v41 }
 0x472   : > { %v1340_v42 = vpop.f32.mrb[28].mxu0 }
 0x473   : > { %v1394_v43 = vmul.f32 0.35355338, %v1340_v42  ;;  %v2228_v44 = vpop.f32.mrb[29].mxu0  ;;  %v1602_v42 = vsel %vm1462_vm5, %v1458_v38, 0 }
 0x474   : > { %v1343_v45 = vpop.f32.mrb[30].mxu0 }
 0x475   : > { %v2229_v46 = vpop.f32.mrb[31].mxu0  ;;  %v1405_v47 = vadd.f32 %v2015_v34, %v1394_v43 }
 0x477   : > { %v1413_v59 = vsel %vm1207_vm4, %v1405_v47, -inf }
 0x47a   : > { %v1294_v48 = vpop.f32.mrb[28].mxu1 }
 0x47b   : > { %v1393_v50 = vmul.f32 0.35355338, %v1294_v48  ;;  %v2222_v51 = vpop.f32.mrb[29].mxu1 }
 0x47c   : > { %v1297_v52 = vpop.f32.mrb[30].mxu1 }
 0x47d   : > { %v2223_v53 = vpop.f32.mrb[31].mxu1  ;;  %v1404_v54 = vadd.f32 %v2015_v34, %v1393_v50  ;;  %v1649_v50 = vld [vmem:[%s2941_s5 + $0x4] sm:$0xf]  ;;  %v1650_v52 = vld [vmem:[%s2941_s5 + $0x8] sm:$0xf] }
 0x47e   : > { %v1702_v51 = vsel %vm1462_vm5, %v1649_v50, 0 }
 0x47f   : > { %v1410_v55 = vsel %vm1207_vm4, %v1404_v54, -inf }
 0x480   : > { %1411 = vmax.xlane.f32.xlu1 %v1410_v55 }
 0x482   : > { %v1386_v56 = vpop.f32.mrb[32].mxu1 }
 0x483   : > { %v1395_v57 = vmul.f32 0.35355338, %v1386_v56  ;;  %v2234_v58 = vpop.f32.mrb[33].mxu1  ;;  %v1748_v56 = vsel %vm1462_vm5, %v1650_v52, 0 }
 0x484   : > { %v1389_v60 = vpop.f32.mrb[34].mxu1  ;;  %1414 = vmax.xlane.f32.xlu1 %v1413_v59  ;;  %v1651_v59 = vld [vmem:[%s2941_s5 + $0xc] sm:$0xf] }
 0x485   : > { %v2235_v61 = vpop.f32.mrb[35].mxu1  ;;  %v1406_v62 = vadd.f32 %v2015_v34, %v1395_v57 }
 0x487   : > { %v1416_v63 = vsel %vm1207_vm4, %v1406_v62, -inf }
 0x488   : > { %1417 = vmax.xlane.f32.xlu1 %v1416_v63  ;;  %v1794_v63 = vsel %vm1462_vm5, %v1651_v59, 0 }
 0x4fd   : > { %v1409_v0 = vpop.xlane.xlu1 %1408 }
 0x4fe   : > { %v1419_v1 = vsub.f32 %v1403_v40, %v1409_v0 }
 0x500   : > { %v1423_v2 = vmul.f32 1.442695, %v1419_v1 }
 0x502   : > { %2366 = vpow2.f32 %v1423_v2 }
 0x50c   : > { %v2367_v3 = vpop.eup %2366 }
 0x50d   : > { %v1412_v4 = vpop.xlane.xlu1 %1411  ;;  %v1431_v6 = vsel %vm1207_vm4, %v2367_v3, 0.0 }
 0x50e   : > { %v1420_v7 = vsub.f32 %v1404_v54, %v1412_v4  ;;  %1432 = vadd.xlane.f32.xlu1 %v1431_v6 }
 0x510   : > { %v1425_v9 = vmul.f32 1.442695, %v1420_v7 }
 0x511   : > { %v1415_v10 = vpop.xlane.xlu1 %1414 }
 0x512   : > { %2368 = vpow2.f32 %v1425_v9  ;;  %v1421_v11 = vsub.f32 %v1405_v47, %v1415_v10  ;;  %v1648_v47 = vld [vmem:[%s2941_s5] sm:$0xf] }
 0x513   : > { %v1656_v48 = vsel %vm1462_vm5, %v1648_v47, 0 }
 0x514   : > { %v1427_v12 = vmul.f32 1.442695, %v1421_v11 }
 0x515   : > { %v1418_v13 = vpop.xlane.xlu1 %1417 }
 0x516   : > { %2370 = vpow2.f32 %v1427_v12  ;;  %v1422_v14 = vsub.f32 %v1406_v62, %v1418_v13 }
 0x518   : > { %v1429_v15 = vmul.f32 1.442695, %v1422_v14 }
 0x51a   : > { %2372 = vpow2.f32 %v1429_v15 }
 0x51c   : > { %v2369_v16 = vpop.eup %2368 }
 0x51d   : > { %v1434_v17 = vsel %vm1207_vm4, %v2369_v16, 0.0 }
 0x51e   : > { %1435 = vadd.xlane.f32.xlu1 %v1434_v17 }
 0x520   : > { %v2371_v18 = vpop.eup %2370 }
 0x521   : > { %v1437_v19 = vsel %vm1207_vm4, %v2371_v18, 0.0 }
 0x522   : > { %1438 = vadd.xlane.f32.xlu1 %v1437_v19 }
 0x524   : > { %v2373_v21 = vpop.eup %2372 }
 0x525   : > { %v1440_v23 = vsel %vm1207_vm4, %v2373_v21, 0.0 }
 0x526   : > { %1441 = vadd.xlane.f32.xlu1 %v1440_v23 }
 0x59b   : > { %v1433_v24 = vpop.xlane.xlu1 %1432 }
 0x59c   : > { %2374 = vrcp.f32 %v1433_v24 }
 0x5a6   : > { %v2375_v27 = vpop.eup %2374 }
 0x5a7   : > { %v1447_v29 = vmul.f32 %v2375_v27, %v2367_v3  ;;  %v1845_v27 = vsub.s32 3, %v2587_v20 }
 0x5a9   : > { %v1451_v31 = vpack.c.bf16 %v1447_v29, %v1447_v29  ;;  %v1846_v5 = vrot.slane %v2593_v22, %v1845_v27 }
 0x5ab   : > { %2239 = vmatmul.mubr.msk.bf16.vlgmr.msra.gmra.mrb[32].mxu0 %vm1207_vm4, %v1451_v31  ;;  %v1436_v33 = vpop.xlane.xlu1 %1435 }
 0x5ac   : > { %2249 = vmatpush3.bf16.msra.mxu0 %v1556_v32  ;;  %2376 = vrcp.f32 %v1436_v33  ;;  %2250 = vmatprep.mubr.msk.bf16.mxu0 %vm2451_vm0, %v2450_v8 }
 0x5ad   : > { %2260 = vmatprep.subr.bf16.mxu0 %v2450_v8 }
 0x5af   : > { %v1439_v34 = vpop.xlane.xlu1 %1438 }
 0x5b0   : > { %2378 = vrcp.f32 %v1439_v34 }
 0x5b3   : > { %v1442_v36 = vpop.xlane.xlu1 %1441 }
 0x5b4   : > { %2380 = vrcp.f32 %v1442_v36 }
 0x5b6   : > { %v2377_v37 = vpop.eup %2376 }
 0x5b7   : > { %v1448_v39 = vmul.f32 %v2377_v37, %v2369_v16 }
 0x5b9   : > { %v1452_v40 = vpack.c.bf16 %v1448_v39, %v1448_v39 }
 0x5ba   : > { %v2379_v41 = vpop.eup %2378 }
 0x5bb   : > { %v1449_v43 = vmul.f32 %v2379_v41, %v2371_v18  ;;  %2245 = vmatmul.mubr.msk.bf16.vlgmr.msra.gmra.mrb[36].mxu1 %vm1207_vm4, %v1452_v40 }
 0x5bc   : > { %2255 = vmatpush3.bf16.msra.mxu1 %v1602_v42  ;;  %2256 = vmatprep.mubr.msk.bf16.mxu1 %vm2451_vm0, %v2450_v8 }
 0x5bd   : > { %v1453_v44 = vpack.c.bf16 %v1449_v43, %v1449_v43  ;;  %2266 = vmatprep.subr.bf16.mxu1 %v2450_v8 }
 0x5be   : > { %v2381_v30 = vpop.eup %2380 }
 0x5bf   : > { %v1450_v45 = vmul.f32 %v2381_v30, %v2373_v21  ;;  %2251 = vmatmul.mubr.msk.bf16.vlgmr.msra.gmra.mrb[36].mxu0 %vm1207_vm4, %v1453_v44 }
 0x5c0   : > { %2262 = vmatprep.mubr.msk.bf16.mxu0 %vm2451_vm0, %v2450_v8  ;;  %2261 = vmatpush3.bf16.msra.mxu0 %v1656_v48 }
 0x5c1   : > { %v1454_v46 = vpack.c.bf16 %v1450_v45, %v1450_v45  ;;  %2272 = vmatprep.subr.bf16.mxu0 %v2450_v8 }
 0x5c3   : > { %2257 = vmatmul.mubr.msk.bf16.vlgmr.msra.gmra.mrb[40].mxu1 %vm1207_vm4, %v1454_v46 }
 0x5c4   : > { %2268 = vmatprep.mubr.msk.bf16.mxu1 %vm2451_vm0, %v2450_v8  ;;  %2267 = vmatpush3.bf16.msra.mxu1 %v1702_v51  ;;  %v1864_v51 = vsub.s32 4, %v2587_v20 }
 0x5c5   : > { %2278 = vmatprep.subr.bf16.mxu1 %v2450_v8 }
 0x5c6   : > { %v1865_v52 = vrot.slane %v2593_v22, %v1864_v51 }
 0x67e   : > { %v1500_v53 = vpop.f32.mrb[32].mxu0 }
 0x67f   : > { %v1644_v54 = vpack.c.bf16 %v1500_v53, %v1500_v53  ;;  %v2240_v55 = vpop.f32.mrb[33].mxu0 }
 0x680   : > { %v1503_v57 = vpop.f32.mrb[34].mxu0 }
 0x681   : > { %v2241_v58 = vpop.f32.mrb[35].mxu0  ;;  %2263 = vmatmul.mubr.msk.bf16.vlgmr.msra.gmra.mrb[40].mxu0 %vm1207_vm4, %v1644_v54 }
 0x682   : > { %2273 = vmatpush3.bf16.msra.mxu0 %v1748_v56  ;;  %2274 = vmatprep.mubr.msk.bf16.mxu0 %vm2451_vm0, %v2450_v8 }
 0x68e   : > { %v1546_v60 = vpop.f32.mrb[36].mxu1 }
 0x68f   : > { %v1645_v61 = vpack.c.bf16 %v1546_v60, %v1546_v60  ;;  %v2246_v62 = vpop.f32.mrb[37].mxu1 }
 0x690   : > { %v1549_v0 = vpop.f32.mrb[38].mxu1 }
 0x691   : > { %v2247_v1 = vpop.f32.mrb[39].mxu1  ;;  %2269 = vmatmul.mubr.msk.bf16.vlgmr.msra.gmra.mrb[44].mxu1 %vm1207_vm4, %v1645_v61 }
 0x692   : > { %v1592_v2 = vpop.f32.mrb[36].mxu0  ;;  %2279 = vmatpush3.bf16.msra.mxu1 %v1794_v63  ;;  %2280 = vmatprep.mubr.msk.bf16.mxu1 %vm2451_vm0, %v2450_v8 }
 0x693   : > { %v1646_v3 = vpack.c.bf16 %v1592_v2, %v1592_v2  ;;  %v2252_v4 = vpop.f32.mrb[37].mxu0 }
 0x694   : > { %v1595_v6 = vpop.f32.mrb[38].mxu0 }
 0x695   : > { %v2253_v7 = vpop.f32.mrb[39].mxu0  ;;  %2275 = vmatmul.mubr.msk.bf16.vlgmr.msra.gmra.mrb[44].mxu0 %vm1207_vm4, %v1646_v3 }
 0x696   : > { %v1638_v9 = vpop.f32.mrb[40].mxu1 }
 0x697   : > { %v1647_v10 = vpack.c.bf16 %v1638_v9, %v1638_v9  ;;  %v2258_v11 = vpop.f32.mrb[41].mxu1 }
 0x698   : > { %v1641_v12 = vpop.f32.mrb[42].mxu1 }
 0x699   : > { %v2259_v13 = vpop.f32.mrb[43].mxu1  ;;  %2281 = vmatmul.mubr.msk.bf16.vlgmr.msra.gmra.mrb[48].mxu1 %vm1207_vm4, %v1647_v10 }
 0x754   : > { %v1692_v14 = vpop.f32.mrb[40].mxu0 }
 0x755   : > { %v2264_v15 = vpop.f32.mrb[41].mxu0  ;;  %v1836_v8 = vsel %vm414_vm3, %v1692_v14, 0.0 }
 0x756   : > { %v1695_v16 = vpop.f32.mrb[42].mxu0 }
 0x757   : > { %v2265_v17 = vpop.f32.mrb[43].mxu0 }
 0x764   : > { %v1738_v18 = vpop.f32.mrb[44].mxu1 }
 0x765   : > { %v1837_v19 = vsel %vm414_vm3, %v1738_v18, 0.0  ;;  %v2270_v21 = vpop.f32.mrb[45].mxu1 }
 0x766   : > { %v1838_v23 = vadd.f32 %v1837_v19, %v1836_v8  ;;  %v1741_v24 = vpop.f32.mrb[46].mxu1 }
 0x767   : > { %v2271_v25 = vpop.f32.mrb[47].mxu1 }
 0x768   : > { %v1784_v26 = vpop.f32.mrb[44].mxu0 }
 0x769   : > { %v1839_v28 = vsel %vm414_vm3, %v1784_v26, 0.0  ;;  %v2276_v29 = vpop.f32.mrb[45].mxu0 }
 0x76a   : > { %v1840_v31 = vadd.f32 %v1839_v28, %v1838_v23  ;;  %v1787_v32 = vpop.f32.mrb[46].mxu0 }
 0x76b   : > { %v2277_v33 = vpop.f32.mrb[47].mxu0 }
 0x76c   : > { %v1830_v34 = vpop.f32.mrb[48].mxu1 }
 0x76d   : > { %v1841_v35 = vsel %vm414_vm3, %v1830_v34, 0.0  ;;  %v2282_v36 = vpop.f32.mrb[49].mxu1 }
 0x76e   : > { %v1842_v37 = vadd.f32 %v1841_v35, %v1840_v31  ;;  %v1833_v38 = vpop.f32.mrb[50].mxu1 }
 0x76f   : > { %v2283_v39 = vpop.f32.mrb[51].mxu1 }
 0x770   : > { %v1847_v40 = vadd.f32 %v1846_v5, %v1842_v37 }
 0x772   : > { %v1848_v41 = vadd.f32 %v1847_v40, %v2621_v49  ;;  %v1869_v49 = vsub.s32 5, %v2587_v20 }
 0x774   : > { %v1849_v42 = vsel %vm414_vm3, %v1848_v41, 0.0  ;;  %v1870_v55 = vrot.slane %v2593_v22, %v1869_v49 }
 0x775   : > { %1850 = vadd.xlane.f32.xlu0 %v1849_v42 }
 0x802   : > { %v1851_v43 = vpop.xlane.xlu0 %1850 }
 0x803   : > { %v1852_v44 = vmul.f32 0.03125, %v1851_v43 }
 0x805   : > { %v1853_v30 = vsub.f32 %v1848_v41, %v1852_v44 }
 0x807   : > { %v1854_v45 = vmul.f32 %v1853_v30, %v1853_v30 }
 0x809   : > { %v1855_v46 = vsel %vm414_vm3, %v1854_v45, 0.0 }
 0x80a   : > { %1856 = vadd.xlane.f32.xlu1 %v1855_v46 }
 0x897   : > { %v1857_v47 = vpop.xlane.xlu1 %1856 }
 0x898   : > { %v1858_v48 = vmul.f32 0.03125, %v1857_v47 }
 0x89a   : > { %v1859_v50 = vadd.f32 1e-12, %v1858_v48 }
 0x89c   : > { %2382 = vrsqrt.f32 %v1859_v50 }
 0x8a6   : > { %v2383_v53 = vpop.eup %2382 }
 0x8a7   : > { %v1861_v54 = vmul.f32 %v2383_v53, %v1853_v30 }
 0x8a9   : > { %v1866_v56 = vmul.f32 %v1865_v52, %v1861_v54 }
 0x8ab   : > { %v1871_v57 = vadd.f32 %v1870_v55, %v1866_v56 }
 0x8ad   : > { %1872 = vst.msk [vmem:[%s307_s17] sm:$0xff] %vm414_vm3, %v1871_v57 }
 0x8ae   : > { %2397 = shalt.err (!%p2394_p3)
}
 0x8af   : > { %s2398_s10 = scalar_lea.hbm %s2893_s21, 128  ;;  %s2402_s13 = scalar_lea.hbm %s2944_s8, 256 }
 0x8b0   : > { %p2399_p4 = scmp.ne.s32.totalorder %s2893_s21, %s2398_s10  ;;  %p2403_p9 = scmp.lt.u32.totalorder %s2893_s21, %s2944_s8 }
 0x8b1   : > { %p2404_p10 = scmp.lt.u32.totalorder %s2402_s13, %s2398_s10  ;;  %p2406_p12 = scmp.lt.u32.totalorder %s2398_s10, %s2893_s21 }
 0x8b2   : > { %p2400_p7 = pnand %p2399_p4, %p2536_p5 }
 0x8b3   : > { %p2405_p11 = por %p2404_p10, %p2403_p9 }
 0x8b4   : > { %p2401_p8 = pneg %p2400_p7 }
 0x8b5   : > { %p2407_p13 = por %p2406_p12, %p2405_p11 }
 0x8b7   : > { %p2408_p0 = pnand %p2407_p13, %p2401_p8 }
 0x8b9   : > { %2411 = shalt.err (!%p2408_p0)
}
 0x8ba   : > { %2296 = dma.vmem_to_hbm [thread:$0]  (%p2536_p5), %s2895_s18, 128, %s2893_s21, %s1874_s22  }
 0x8bb PF: > { %p2302_p1 = scmp.ge.s32.totalorder %s2446_s30, 2  ;;  %s1899_s20 = sand.u32 1, %s2434_s27  }
 0x8bc   : > { %s1900_s23 = scalar_lea.sflag [#allocation3], %s1899_s20 }
 0x8bd   : > { %p2299_p2 = pnand %p2302_p1, %p2540_p6 }
 0x8bf   : > { %2429 = dma.done.wait (!%p2299_p2), %s1900_s23, 128  }
 0x8c0   : > { %2431 = vsyncadd (!%p2299_p2), %s1900_s23, 4294967168  ;;  %p18_p3 = scmp.ge.s32.totalorder %s2523_s11, 4   ;;  %s2947_s27 = smov %s2438_s28 }
 0x8c1   : > { %s2948_s28 = smov %s2442_s29  ;;  %s2949_s29 = smov %s2534_s14 }
 0x8c2   : > { %s2950_s30 = smov %s2523_s11  ;;  %20 = sbr.rel (!%p18_p3) target bundleno = 3 (0x3), region = 90 }
 0x8c9   :  { %1905 = vsyncpa [#allocation3], 1 }
 0x8ca   :  { %1907 = vsyncpa [#allocation3 + $0x1], 1 }

</bundles_post_ra>
